<compile_context>
chip_gen: v7x
topology: tpu7x:2x2x1
jax: 0.10.0
libtpu: 0.0.40
codegen_flags: <defaults>
</compile_context>

<pallas_src>
import functools

import jax
import jax.numpy as jnp
from jax import lax
from jax.experimental import pallas as pl
from jax.experimental.pallas import tpu as pltpu


def _round_up(v, m):
    return (v + m - 1) // m * m


def _conv3x3_kernel(xf_ref, w_ref, b_ref, o_ref, patches_ref, *,
                    wp, c, l, n_batch):
    """Single grid step computing the whole batch.

    xf_ref     : (N, C, FLAT) input dtype -- per-batch flattened padded image
                 (row stride WP, one trailing zero row, trailing zero columns).
    w_ref      : (Cout, Kp)   compute dtype -- fused 3x3 weights, tap-major /
                 channel-minor, zero-padded from K = 9*C to Kp.
    b_ref      : (Cout, 1)    f32 bias.
    o_ref      : (N, Cout, L) lane-dense output slabs, L = H * WP.
    patches_ref: (Kp, N*L)    VMEM scratch holding the im2col matrix.
    """
    kp = patches_ref.shape[0]
    k_real = 9 * c

    # Padded K rows meet zero weight columns, but uninitialized VMEM may hold
    # NaN/Inf bit patterns (0 * NaN = NaN), so zero them explicitly once.
    if kp > k_real:
        patches_ref[k_real:, :] = jnp.zeros(
            (kp - k_real, patches_ref.shape[1]), patches_ref.dtype)

    # im2col: load each batch element's flat slab once; the 9 taps are
    # in-register lane-shifted slices (XLU), not 9 misaligned VMEM loads.
    # Row block = tap (C rows each), column block = batch element (L lanes).
    for nb in range(n_batch):
        xnb = xf_ref[nb]                                    # (C, FLAT)
        for dy in range(3):
            for dx in range(3):
                tap = dy * 3 + dx
                off = dy * wp + dx
                patches_ref[tap * c:(tap + 1) * c, nb * l:(nb + 1) * l] = (
                    xnb[:, off:off + l].astype(patches_ref.dtype))

    # One fused matmul over the packed K dim; f32 accumulation on the MXU.
    acc = jnp.dot(w_ref[...], patches_ref[...],
                  preferred_element_type=jnp.float32)       # (Cout, N*L)
    acc = acc + b_ref[...]                                  # (Cout, 1) bcast

    for nb in range(n_batch):                               # 384-lane aligned
        o_ref[nb] = acc[:, nb * l:(nb + 1) * l].astype(o_ref.dtype)


def make_conv3x3_params(weight, bias, compute_dtype=jnp.bfloat16):
    """Fuse (Cout, C, 3, 3) weights into (Cout, Kp) ONCE (module-init cost)."""
    cout, c, kh, kw = weight.shape
    assert (kh, kw) == (3, 3)
    k_real = 9 * c
    sub = 16 if compute_dtype == jnp.bfloat16 else 8   # bf16 packs 16 sublanes
    kp = _round_up(k_real, sub)
    # Tap-major / channel-minor, matching the im2col row order in the kernel.
    w_fused = jnp.transpose(weight, (0, 2, 3, 1)).reshape(cout, k_real)
    w_fused = jnp.pad(w_fused, ((0, 0), (0, kp - k_real))).astype(compute_dtype)
    b2 = bias.reshape(cout, 1).astype(jnp.float32)
    return w_fused, b2


@functools.partial(jax.jit, static_argnames=("use_refl",))
def conv3x3_apply(x, w_fused, b2, use_refl=True):
    """x: (N, C, H, W); w_fused/b2 from make_conv3x3_params."""
    n, c, h, w = x.shape
    cout, kp = w_fused.shape
    assert kp >= 9 * c

    wp = _round_up(w + 2, 8)      # padded row stride (H*WP lane-friendly)
    l = h * wp                    # lane width of one batch's output slab
    flat = (h + 3) * wp           # (H+2) real rows + 1 trailing zero row

    pad_mode = "reflect" if use_refl else "constant"
    xp = jnp.pad(x, ((0, 0), (0, 0), (1, 1), (1, 1)), mode=pad_mode)
    # One constant pad: extra zero columns up to WP (they only feed output
    # columns that are trimmed below) + one zero row (covers the dy=2,dx=2
    # slice end).  Then flatten spatial onto the lane axis.
    xp = jnp.pad(xp, ((0, 0), (0, 0), (0, 1), (0, wp - (w + 2))))
    xf = xp.reshape(n, c, flat)

    kernel = functools.partial(_conv3x3_kernel, wp=wp, c=c, l=l, n_batch=n)

    out_flat = pl.pallas_call(
        kernel,
        out_shape=jax.ShapeDtypeStruct((n, cout, l), x.dtype),
        grid_spec=pltpu.PrefetchScalarGridSpec(
            num_scalar_prefetch=0,
            grid=(1,),
            in_specs=[
                pl.BlockSpec((n, c, flat), lambda i: (0, 0, 0)),
                pl.BlockSpec((cout, kp), lambda i: (0, 0)),
                pl.BlockSpec((cout, 1), lambda i: (0, 0)),
            ],
            out_specs=pl.BlockSpec((n, cout, l), lambda i: (0, 0, 0)),
            scratch_shapes=[pltpu.VMEM((kp, n * l), w_fused.dtype)],
        ),
        compiler_params=pltpu.CompilerParams(
            dimension_semantics=("arbitrary",),
        ),
    )(xf, w_fused, b2)

    # Trim the garbage columns and restore NCHW (layout plumbing only).
    return out_flat.reshape(n, cout, h, wp)[:, :, :, :w]


def conv3x3(x, weight, bias, use_refl=True, compute_dtype=jnp.bfloat16):
    """One-shot convenience wrapper (params fused per call)."""
    w_fused, b2 = make_conv3x3_params(weight, bias, compute_dtype)
    return conv3x3_apply(x, w_fused, b2, use_refl=use_refl)


if __name__ == "__main__":
    # Small shapes consistent with the module: batch=2, in_channels=4,
    # out_channels=8, spatial=16x16.
    N, Cin, Cout, H, W = 2, 4, 8, 16, 16

    key = jax.random.PRNGKey(0)
    kx, kw, kb = jax.random.split(key, 3)

    x = jax.random.normal(kx, (N, Cin, H, W), dtype=jnp.float32)
    fan_in = Cin * 3 * 3
    bound = 1.0 / (fan_in ** 0.5)
    weight = jax.random.uniform(kw, (Cout, Cin, 3, 3),
                                minval=-bound, maxval=bound, dtype=jnp.float32)
    bias = jax.random.uniform(kb, (Cout,),
                              minval=-bound, maxval=bound, dtype=jnp.float32)

    def ref_conv(xin, win):
        xpad = jnp.pad(xin, ((0, 0), (0, 0), (1, 1), (1, 1)), mode="reflect")
        return lax.conv_general_dilated(
            xpad, win, window_strides=(1, 1), padding="VALID",
            dimension_numbers=("NCHW", "OIHW", "NCHW"),
            precision=lax.Precision.HIGHEST,
        ) + bias[None, :, None, None]

    ref = ref_conv(x, weight)

    # --- exact f32 configuration: matches the module to 1e-4 ---
    w32, b32 = make_conv3x3_params(weight, bias, compute_dtype=jnp.float32)
    out_f32 = jax.block_until_ready(conv3x3_apply(x, w32, b32, use_refl=True))
    assert out_f32.shape == (N, Cout, H, W)
    assert jnp.allclose(out_f32, ref, atol=1e-4, rtol=1e-4), \
        float(jnp.max(jnp.abs(out_f32 - ref)))

    # --- default bf16-operand configuration (f32 accumulation) ---
    wbf, bbf = make_conv3x3_params(weight, bias, compute_dtype=jnp.bfloat16)
    out_bf = jax.block_until_ready(conv3x3_apply(x, wbf, bbf, use_refl=True))
    assert out_bf.shape == (N, Cout, H, W)
    # Structural check: identical math with operands pre-rounded to bf16.
    ref_bf = ref_conv(x.astype(jnp.bfloat16).astype(jnp.float32),
                      weight.astype(jnp.bfloat16).astype(jnp.float32))
    assert jnp.allclose(out_bf, ref_bf, atol=2e-3, rtol=2e-3), \
        float(jnp.max(jnp.abs(out_bf - ref_bf)))
    # Sanity bound vs the exact f32 reference (bf16 quantization error only).
    assert jnp.allclose(out_bf, ref, atol=1e-1, rtol=1e-1), \
        float(jnp.max(jnp.abs(out_bf - ref)))

    print("KERNEL_OK")
</pallas_src>

<mosaic_0001>
module attributes {stable_mosaic.version = 11 : i64} {
  func.func @_conv3x3_kernel(%arg0: i32, %arg1: memref<2x4x456xf32, #tpu.memory_space<vmem>>, %arg2: memref<8x40xf32, #tpu.memory_space<vmem>>, %arg3: memref<8x1xf32, #tpu.memory_space<vmem>>, %arg4: memref<2x8x384xf32, #tpu.memory_space<vmem>>, %arg5: memref<40x768xf32, #tpu.memory_space<vmem>>) attributes {dimension_semantics = [#tpu.dimension_semantics<arbitrary>], iteration_bounds = array<i64: 1>, scalar_prefetch = 0 : i64, scratch_operands = 1 : i64, tpu.core_type = #tpu.core_type<tc>, window_params = [{pipeline_mode = #tpu.pipeline_mode<synchronous>, transform_indices = @transform_0, window_bounds = array<i64: 2, 4, 456>}, {pipeline_mode = #tpu.pipeline_mode<synchronous>, transform_indices = @transform_1, window_bounds = array<i64: 8, 40>}, {pipeline_mode = #tpu.pipeline_mode<synchronous>, transform_indices = @transform_2, window_bounds = array<i64: 8, 1>}, {pipeline_mode = #tpu.pipeline_mode<synchronous>, transform_indices = @transform_3, window_bounds = array<i64: 2, 8, 384>}]} {
    %cst = arith.constant 0.000000e+00 : f32
    %0 = vector.broadcast %cst : f32 to vector<4x768xf32>
    %c36 = arith.constant 36 : index
    %c0 = arith.constant 0 : index
    %1 = vector.load %arg5[%c36, %c0] : memref<40x768xf32, #tpu.memory_space<vmem>>, vector<4x768xf32>
    tpu.vector_store %arg5[%c36, %c0], %0 {strides = array<i32>} : memref<40x768xf32, #tpu.memory_space<vmem>>, vector<4x768xf32>,
    %c0_0 = arith.constant 0 : index
    %c0_1 = arith.constant 0 : index
    %c0_2 = arith.constant 0 : index
    %2 = vector.load %arg1[%c0_0, %c0_1, %c0_2] : memref<2x4x456xf32, #tpu.memory_space<vmem>>, vector<1x4x456xf32>
    %3 = vector.shape_cast %2 : vector<1x4x456xf32> to vector<4x456xf32>
    %4 = vector.extract_strided_slice %3 {offsets = [0, 0], sizes = [4, 384], strides = [1, 1]} : vector<4x456xf32> to vector<4x384xf32>
    %c0_3 = arith.constant 0 : index
    %c0_4 = arith.constant 0 : index
    %5 = vector.load %arg5[%c0_3, %c0_4] : memref<40x768xf32, #tpu.memory_space<vmem>>, vector<4x384xf32>
    tpu.vector_store %arg5[%c0_3, %c0_4], %4 {strides = array<i32>} : memref<40x768xf32, #tpu.memory_space<vmem>>, vector<4x384xf32>,
    %6 = vector.extract_strided_slice %3 {offsets = [0, 1], sizes = [4, 384], strides = [1, 1]} : vector<4x456xf32> to vector<4x384xf32>
    %c4 = arith.constant 4 : index
    %c0_5 = arith.constant 0 : index
    %7 = vector.load %arg5[%c4, %c0_5] : memref<40x768xf32, #tpu.memory_space<vmem>>, vector<4x384xf32>
    tpu.vector_store %arg5[%c4, %c0_5], %6 {strides = array<i32>} : memref<40x768xf32, #tpu.memory_space<vmem>>, vector<4x384xf32>,
    %8 = vector.extract_strided_slice %3 {offsets = [0, 2], sizes = [4, 384], strides = [1, 1]} : vector<4x456xf32> to vector<4x384xf32>
    %c8 = arith.constant 8 : index
    %c0_6 = arith.constant 0 : index
    %9 = vector.load %arg5[%c8, %c0_6] : memref<40x768xf32, #tpu.memory_space<vmem>>, vector<4x384xf32>
    tpu.vector_store %arg5[%c8, %c0_6], %8 {strides = array<i32>} : memref<40x768xf32, #tpu.memory_space<vmem>>, vector<4x384xf32>,
    %10 = vector.extract_strided_slice %3 {offsets = [0, 24], sizes = [4, 384], strides = [1, 1]} : vector<4x456xf32> to vector<4x384xf32>
    %c12 = arith.constant 12 : index
    %c0_7 = arith.constant 0 : index
    %11 = vector.load %arg5[%c12, %c0_7] : memref<40x768xf32, #tpu.memory_space<vmem>>, vector<4x384xf32>
    tpu.vector_store %arg5[%c12, %c0_7], %10 {strides = array<i32>} : memref<40x768xf32, #tpu.memory_space<vmem>>, vector<4x384xf32>,
    %12 = vector.extract_strided_slice %3 {offsets = [0, 25], sizes = [4, 384], strides = [1, 1]} : vector<4x456xf32> to vector<4x384xf32>
    %c16 = arith.constant 16 : index
    %c0_8 = arith.constant 0 : index
    %13 = vector.load %arg5[%c16, %c0_8] : memref<40x768xf32, #tpu.memory_space<vmem>>, vector<4x384xf32>
    tpu.vector_store %arg5[%c16, %c0_8], %12 {strides = array<i32>} : memref<40x768xf32, #tpu.memory_space<vmem>>, vector<4x384xf32>,
    %14 = vector.extract_strided_slice %3 {offsets = [0, 26], sizes = [4, 384], strides = [1, 1]} : vector<4x456xf32> to vector<4x384xf32>
    %c20 = arith.constant 20 : index
    %c0_9 = arith.constant 0 : index
    %15 = vector.load %arg5[%c20, %c0_9] : memref<40x768xf32, #tpu.memory_space<vmem>>, vector<4x384xf32>
    tpu.vector_store %arg5[%c20, %c0_9], %14 {strides = array<i32>} : memref<40x768xf32, #tpu.memory_space<vmem>>, vector<4x384xf32>,
    %16 = vector.extract_strided_slice %3 {offsets = [0, 48], sizes = [4, 384], strides = [1, 1]} : vector<4x456xf32> to vector<4x384xf32>
    %c24 = arith.constant 24 : index
    %c0_10 = arith.constant 0 : index
    %17 = vector.load %arg5[%c24, %c0_10] : memref<40x768xf32, #tpu.memory_space<vmem>>, vector<4x384xf32>
    tpu.vector_store %arg5[%c24, %c0_10], %16 {strides = array<i32>} : memref<40x768xf32, #tpu.memory_space<vmem>>, vector<4x384xf32>,
    %18 = vector.extract_strided_slice %3 {offsets = [0, 49], sizes = [4, 384], strides = [1, 1]} : vector<4x456xf32> to vector<4x384xf32>
    %c28 = arith.constant 28 : index
    %c0_11 = arith.constant 0 : index
    %19 = vector.load %arg5[%c28, %c0_11] : memref<40x768xf32, #tpu.memory_space<vmem>>, vector<4x384xf32>
    tpu.vector_store %arg5[%c28, %c0_11], %18 {strides = array<i32>} : memref<40x768xf32, #tpu.memory_space<vmem>>, vector<4x384xf32>,
    %20 = vector.extract_strided_slice %3 {offsets = [0, 50], sizes = [4, 384], strides = [1, 1]} : vector<4x456xf32> to vector<4x384xf32>
    %c32 = arith.constant 32 : index
    %c0_12 = arith.constant 0 : index
    %21 = vector.load %arg5[%c32, %c0_12] : memref<40x768xf32, #tpu.memory_space<vmem>>, vector<4x384xf32>
    tpu.vector_store %arg5[%c32, %c0_12], %20 {strides = array<i32>} : memref<40x768xf32, #tpu.memory_space<vmem>>, vector<4x384xf32>,
    %c1 = arith.constant 1 : index
    %c0_13 = arith.constant 0 : index
    %c0_14 = arith.constant 0 : index
    %22 = vector.load %arg1[%c1, %c0_13, %c0_14] : memref<2x4x456xf32, #tpu.memory_space<vmem>>, vector<1x4x456xf32>
    %23 = vector.shape_cast %22 : vector<1x4x456xf32> to vector<4x456xf32>
    %24 = vector.extract_strided_slice %23 {offsets = [0, 0], sizes = [4, 384], strides = [1, 1]} : vector<4x456xf32> to vector<4x384xf32>
    %c0_15 = arith.constant 0 : index
    %c384 = arith.constant 384 : index
    %25 = vector.load %arg5[%c0_15, %c384] : memref<40x768xf32, #tpu.memory_space<vmem>>, vector<4x384xf32>
    tpu.vector_store %arg5[%c0_15, %c384], %24 {strides = array<i32>} : memref<40x768xf32, #tpu.memory_space<vmem>>, vector<4x384xf32>,
    %26 = vector.extract_strided_slice %23 {offsets = [0, 1], sizes = [4, 384], strides = [1, 1]} : vector<4x456xf32> to vector<4x384xf32>
    %c4_16 = arith.constant 4 : index
    %c384_17 = arith.constant 384 : index
    %27 = vector.load %arg5[%c4_16, %c384_17] : memref<40x768xf32, #tpu.memory_space<vmem>>, vector<4x384xf32>
    tpu.vector_store %arg5[%c4_16, %c384_17], %26 {strides = array<i32>} : memref<40x768xf32, #tpu.memory_space<vmem>>, vector<4x384xf32>,
    %28 = vector.extract_strided_slice %23 {offsets = [0, 2], sizes = [4, 384], strides = [1, 1]} : vector<4x456xf32> to vector<4x384xf32>
    %c8_18 = arith.constant 8 : index
    %c384_19 = arith.constant 384 : index
    %29 = vector.load %arg5[%c8_18, %c384_19] : memref<40x768xf32, #tpu.memory_space<vmem>>, vector<4x384xf32>
    tpu.vector_store %arg5[%c8_18, %c384_19], %28 {strides = array<i32>} : memref<40x768xf32, #tpu.memory_space<vmem>>, vector<4x384xf32>,
    %30 = vector.extract_strided_slice %23 {offsets = [0, 24], sizes = [4, 384], strides = [1, 1]} : vector<4x456xf32> to vector<4x384xf32>
    %c12_20 = arith.constant 12 : index
    %c384_21 = arith.constant 384 : index
    %31 = vector.load %arg5[%c12_20, %c384_21] : memref<40x768xf32, #tpu.memory_space<vmem>>, vector<4x384xf32>
    tpu.vector_store %arg5[%c12_20, %c384_21], %30 {strides = array<i32>} : memref<40x768xf32, #tpu.memory_space<vmem>>, vector<4x384xf32>,
    %32 = vector.extract_strided_slice %23 {offsets = [0, 25], sizes = [4, 384], strides = [1, 1]} : vector<4x456xf32> to vector<4x384xf32>
    %c16_22 = arith.constant 16 : index
    %c384_23 = arith.constant 384 : index
    %33 = vector.load %arg5[%c16_22, %c384_23] : memref<40x768xf32, #tpu.memory_space<vmem>>, vector<4x384xf32>
    tpu.vector_store %arg5[%c16_22, %c384_23], %32 {strides = array<i32>} : memref<40x768xf32, #tpu.memory_space<vmem>>, vector<4x384xf32>,
    %34 = vector.extract_strided_slice %23 {offsets = [0, 26], sizes = [4, 384], strides = [1, 1]} : vector<4x456xf32> to vector<4x384xf32>
    %c20_24 = arith.constant 20 : index
    %c384_25 = arith.constant 384 : index
    %35 = vector.load %arg5[%c20_24, %c384_25] : memref<40x768xf32, #tpu.memory_space<vmem>>, vector<4x384xf32>
    tpu.vector_store %arg5[%c20_24, %c384_25], %34 {strides = array<i32>} : memref<40x768xf32, #tpu.memory_space<vmem>>, vector<4x384xf32>,
    %36 = vector.extract_strided_slice %23 {offsets = [0, 48], sizes = [4, 384], strides = [1, 1]} : vector<4x456xf32> to vector<4x384xf32>
    %c24_26 = arith.constant 24 : index
    %c384_27 = arith.constant 384 : index
    %37 = vector.load %arg5[%c24_26, %c384_27] : memref<40x768xf32, #tpu.memory_space<vmem>>, vector<4x384xf32>
    tpu.vector_store %arg5[%c24_26, %c384_27], %36 {strides = array<i32>} : memref<40x768xf32, #tpu.memory_space<vmem>>, vector<4x384xf32>,
    %38 = vector.extract_strided_slice %23 {offsets = [0, 49], sizes = [4, 384], strides = [1, 1]} : vector<4x456xf32> to vector<4x384xf32>
    %c28_28 = arith.constant 28 : index
    %c384_29 = arith.constant 384 : index
    %39 = vector.load %arg5[%c28_28, %c384_29] : memref<40x768xf32, #tpu.memory_space<vmem>>, vector<4x384xf32>
    tpu.vector_store %arg5[%c28_28, %c384_29], %38 {strides = array<i32>} : memref<40x768xf32, #tpu.memory_space<vmem>>, vector<4x384xf32>,
    %40 = vector.extract_strided_slice %23 {offsets = [0, 50], sizes = [4, 384], strides = [1, 1]} : vector<4x456xf32> to vector<4x384xf32>
    %c32_30 = arith.constant 32 : index
    %c384_31 = arith.constant 384 : index
    %41 = vector.load %arg5[%c32_30, %c384_31] : memref<40x768xf32, #tpu.memory_space<vmem>>, vector<4x384xf32>
    tpu.vector_store %arg5[%c32_30, %c384_31], %40 {strides = array<i32>} : memref<40x768xf32, #tpu.memory_space<vmem>>, vector<4x384xf32>,
    %c0_32 = arith.constant 0 : index
    %c0_33 = arith.constant 0 : index
    %42 = vector.load %arg2[%c0_32, %c0_33] : memref<8x40xf32, #tpu.memory_space<vmem>>, vector<8x40xf32>
    %c0_34 = arith.constant 0 : index
    %c0_35 = arith.constant 0 : index
    %43 = vector.load %arg5[%c0_34, %c0_35] : memref<40x768xf32, #tpu.memory_space<vmem>>, vector<40x768xf32>
    %cst_36 = arith.constant dense<0.000000e+00> : vector<8x768xf32>
    %44 = tpu.matmul %42, %43, %cst_36 {dimension_numbers = #tpu.dot_dimension_numbers<[1], [0], [0], [1], [0, 0, 1, 1], [], []>} : vector<8x40xf32>, vector<40x768xf32>, vector<8x768xf32> -> vector<8x768xf32>
    %c0_37 = arith.constant 0 : index
    %c0_38 = arith.constant 0 : index
    %45 = vector.load %arg3[%c0_37, %c0_38] : memref<8x1xf32, #tpu.memory_space<vmem>>, vector<8x1xf32>
    %46 = vector.broadcast %45 : vector<8x1xf32> to vector<8x768xf32>
    %47 = arith.addf %44, %46 : vector<8x768xf32>
    %48 = vector.extract_strided_slice %47 {offsets = [0, 0], sizes = [8, 384], strides = [1, 1]} : vector<8x768xf32> to vector<8x384xf32>
    %c0_39 = arith.constant 0 : index
    %c0_40 = arith.constant 0 : index
    %c0_41 = arith.constant 0 : index
    %49 = vector.load %arg4[%c0_39, %c0_40, %c0_41] : memref<2x8x384xf32, #tpu.memory_space<vmem>>, vector<1x8x384xf32>
    %50 = vector.shape_cast %49 : vector<1x8x384xf32> to vector<8x384xf32>
    %51 = vector.shape_cast %48 : vector<8x384xf32> to vector<1x8x384xf32>
    tpu.vector_store %arg4[%c0_39, %c0_40, %c0_41], %51 {strides = array<i32>} : memref<2x8x384xf32, #tpu.memory_space<vmem>>, vector<1x8x384xf32>,
    %52 = vector.extract_strided_slice %47 {offsets = [0, 384], sizes = [8, 384], strides = [1, 1]} : vector<8x768xf32> to vector<8x384xf32>
    %c1_42 = arith.constant 1 : index
    %c0_43 = arith.constant 0 : index
    %c0_44 = arith.constant 0 : index
    %53 = vector.load %arg4[%c1_42, %c0_43, %c0_44] : memref<2x8x384xf32, #tpu.memory_space<vmem>>, vector<1x8x384xf32>
    %54 = vector.shape_cast %53 : vector<1x8x384xf32> to vector<8x384xf32>
    %55 = vector.shape_cast %52 : vector<8x384xf32> to vector<1x8x384xf32>
    tpu.vector_store %arg4[%c1_42, %c0_43, %c0_44], %55 {strides = array<i32>} : memref<2x8x384xf32, #tpu.memory_space<vmem>>, vector<1x8x384xf32>,
    return
  }
  func.func @transform_0(%arg0: i32) -> (i32, i32, i32) {
    %c0_i32 = arith.constant 0 : i32
    %c0_i32_0 = arith.constant 0 : i32
    %c0_i32_1 = arith.constant 0 : i32
    %c0_i32_2 = arith.constant 0 : i32
    return %c0_i32, %c0_i32_0, %c0_i32_1 : i32, i32, i32
  }
  func.func @transform_1(%arg0: i32) -> (i32, i32) {
    %c0_i32 = arith.constant 0 : i32
    %c0_i32_0 = arith.constant 0 : i32
    %c0_i32_1 = arith.constant 0 : i32
    return %c0_i32, %c0_i32_0 : i32, i32
  }
  func.func @transform_2(%arg0: i32) -> (i32, i32) {
    %c0_i32 = arith.constant 0 : i32
    %c0_i32_0 = arith.constant 0 : i32
    %c0_i32_1 = arith.constant 0 : i32
    return %c0_i32, %c0_i32_0 : i32, i32
  }
  func.func @transform_3(%arg0: i32) -> (i32, i32, i32) {
    %c0_i32 = arith.constant 0 : i32
    %c0_i32_0 = arith.constant 0 : i32
    %c0_i32_1 = arith.constant 0 : i32
    %c0_i32_2 = arith.constant 0 : i32
    return %c0_i32, %c0_i32_0, %c0_i32_1 : i32, i32, i32
  }
}

</mosaic_0001>

<bundles_post_ra>
// kernel: conv3x3_apply.1
= control target key start
LH: loop header
LB: loop body
LE: loop exit
PB: predicated region body
PF: predicated region fallthrough
CT: control target
= control target key end

     0   :  { %s641_s18 = smov 126   ;;  %s642_s19 = smov 127   ;;  %v648_v8 = vmov 0.0   ;;  %vm39_vm0 = vcmask 1039360   ;;  %vm58_vm1 = vcmask 1031168   ;;  %vm76_vm2 = vcmask 850944   ;;  %s939_s0 = inlined_call_operand.vmem [shape: f32[2,4,456], index: 0, kind: input, shape index: {}]   ;;  %s940_s2 = inlined_call_operand.vmem [shape: f32[8,1], index: 2, kind: input, shape index: {}]   ;;  %s941_s1 = inlined_call_operand.vmem [shape: f32[8,40], index: 1, kind: input, shape index: {}]   ;;  %s942_s3 = inlined_call_operand.vmem [shape: f32[2,8,384], index: 3, kind: output, shape index: {}]  }
   0x1   :  { %v674_v0 = vld [vmem:[%s939_s0 + $0x8] sm:$0xff]  ;;  %v679_v1 = vld [vmem:[%s939_s0] sm:$0xff]  ;;  %v684_v2 = vld [vmem:[%s939_s0 + $0x10] sm:$0xff]  ;;  %s643_s22 = smov 104   ;;  %s645_s23 = smov 102   ;;  %430 = vmatprep.mubr.f32.mxu0 %v648_v8  ;;  %501 = vmatprep.mubr.f32.mxu1 %v648_v8  ;;  %v650_v22 = vmov 0  }
   0x2   :  { %54 = vrot.lane.b32.xlu1 %v674_v0, %s641_s18  ;;  %28 = vst [vmem:[#allocation2 + $0x10] sm:$0xf] %v674_v0  ;;  %33 = vrot.lane.b32.xlu0 %v679_v1, %s642_s19  ;;  %26 = vst [vmem:[#allocation2] sm:$0xf] %v679_v1  ;;  %v30_v3 = vcombine.low %v674_v0, %v674_v0  ;;  %v24_v4 = vcombine.high %v679_v1, %v679_v1  ;;  %v700_v5 = vld [vmem:[%s939_s0 + $0x18] sm:$0xff]  ;;  %s644_s0 = smov 103  }
   0x3   :  { %183 = vst [vmem:[#allocation2 + $0x18] sm:$0xf] %v684_v2  ;;  %185 = vst [vmem:[#allocation2 + $0x28] sm:$0xf] %v700_v5  ;;  %v705_v6 = vcombine.high %v684_v2, %v684_v2  ;;  %v29_v7 = vcombine.low %v679_v1, %v679_v1  ;;  %s646_s24 = smov 80   ;;  %s647_s25 = smov 79   ;;  %v186_v9 = vcombine.low %v684_v2, %v684_v2  ;;  %632 = vset.pattern.permute.xlu0 %v650_v22 }
   0x4   :  { %27 = vst [vmem:[#allocation2 + $0x8] sm:$0xf] %v24_v4  ;;  %15 = vst [vmem:[#allocation2 + $0xc8] sm:$0xf0] %v648_v8  ;;  %s649_s26 = smov 78   ;;  %v187_v10 = vcombine.low %v700_v5, %v700_v5  ;;  %v205_v11 = vcombine.high %v700_v5, %v700_v5  ;;  %v49_v12 = vcombine.high %v674_v0, %v674_v0  ;;  %v356_v23 = vld [vmem:[%s940_s2] sm:$0xff] }
   0x5   :  { %184 = vst [vmem:[#allocation2 + $0x20] sm:$0xf] %v705_v6  ;;  %14 = vst [vmem:[#allocation2 + $0xc0] sm:$0xf0] %v648_v8  ;;  %vm94_vm3 = vcmask 842752   ;;  %vm112_vm4 = vcmask 834560  }
   0x6   :  { %35 = vrot.lane.b32.xlu0 %v30_v3, %s642_s19  ;;  %52 = vrot.lane.b32.xlu1 %v24_v4, %s641_s18  ;;  %16 = vst [vmem:[#allocation2 + $0xd0] sm:$0xf0] %v648_v8  ;;  %17 = vst [vmem:[#allocation2 + $0xd8] sm:$0xf0] %v648_v8  ;;  %vm130_vm5 = vcmask 654336   ;;  %vm148_vm6 = vcmask 646144  }
   0x7   :  { %18 = vst [vmem:[#allocation2 + $0xe0] sm:$0xf0] %v648_v8  ;;  %19 = vst [vmem:[#allocation2 + $0xe8] sm:$0xf0] %v648_v8  ;;  %vm166_vm7 = vcmask 637952   ;;  %vm362_vm8 = vcmask 326656  }
   0xa   :  { %70 = vrot.lane.b32.xlu0 %v679_v1, %s643_s22  ;;  %72 = vrot.lane.b32.xlu1 %v30_v3, %s643_s22 }
   0xe   :  { %31 = vrot.lane.b32.xlu0 %v29_v7, %s642_s19  ;;  %50 = vrot.lane.b32.xlu1 %v679_v1, %s641_s18 }
  0x12   :  { %68 = vrot.lane.b32.xlu0 %v29_v7, %s643_s22  ;;  %88 = vrot.lane.b32.xlu1 %v24_v4, %s644_s0 }
  0x16   :  { %90 = vrot.lane.b32.xlu0 %v674_v0, %s644_s0  ;;  %106 = vrot.lane.b32.xlu1 %v679_v1, %s645_s23 }
  0x1a   :  { %108 = vrot.lane.b32.xlu0 %v30_v3, %s645_s23  ;;  %124 = vrot.lane.b32.xlu1 %v24_v4, %s646_s24 }
  0x1e   :  { %126 = vrot.lane.b32.xlu0 %v674_v0, %s646_s24  ;;  %142 = vrot.lane.b32.xlu1 %v679_v1, %s647_s25 }
  0x22   :  { %144 = vrot.lane.b32.xlu0 %v30_v3, %s647_s25  ;;  %86 = vrot.lane.b32.xlu1 %v679_v1, %s644_s0 }
  0x26   :  { %104 = vrot.lane.b32.xlu0 %v29_v7, %s645_s23  ;;  %122 = vrot.lane.b32.xlu1 %v679_v1, %s646_s24 }
  0x2a   :  { %140 = vrot.lane.b32.xlu0 %v29_v7, %s647_s25  ;;  %160 = vrot.lane.b32.xlu1 %v24_v4, %s649_s26 }
  0x2e   :  { %162 = vrot.lane.b32.xlu0 %v674_v0, %s649_s26  ;;  %188 = vrot.lane.b32.xlu1 %v186_v9, %s642_s19 }
  0x32   :  { %190 = vrot.lane.b32.xlu0 %v684_v2, %s642_s19  ;;  %192 = vrot.lane.b32.xlu1 %v187_v10, %s642_s19 }
  0x36   :  { %194 = vrot.lane.b32.xlu0 %v700_v5, %s642_s19  ;;  %206 = vrot.lane.b32.xlu1 %v684_v2, %s641_s18 }
  0x3a   :  { %208 = vrot.lane.b32.xlu0 %v705_v6, %s641_s18  ;;  %210 = vrot.lane.b32.xlu1 %v700_v5, %s641_s18 }
  0x3e   :  { %212 = vrot.lane.b32.xlu0 %v205_v11, %s641_s18  ;;  %223 = vrot.lane.b32.xlu1 %v186_v9, %s643_s22 }
  0x42   :  { %225 = vrot.lane.b32.xlu0 %v684_v2, %s643_s22  ;;  %227 = vrot.lane.b32.xlu1 %v187_v10, %s643_s22 }
  0x46   :  { %229 = vrot.lane.b32.xlu0 %v700_v5, %s643_s22  ;;  %37 = vrot.lane.b32.xlu1 %v674_v0, %s642_s19 }
  0x4a   :  { %56 = vrot.lane.b32.xlu0 %v49_v12, %s641_s18  ;;  %74 = vrot.lane.b32.xlu1 %v674_v0, %s643_s22 }
  0x4e   :  { %158 = vrot.lane.b32.xlu0 %v679_v1, %s649_s26  ;;  %240 = vrot.lane.b32.xlu1 %v684_v2, %s644_s0 }
  0x52   :  { %242 = vrot.lane.b32.xlu0 %v705_v6, %s644_s0  ;;  %244 = vrot.lane.b32.xlu1 %v700_v5, %s644_s0 }
  0x56   :  { %246 = vrot.lane.b32.xlu0 %v205_v11, %s644_s0  ;;  %257 = vrot.lane.b32.xlu1 %v186_v9, %s645_s23 }
  0x5a   :  { %259 = vrot.lane.b32.xlu0 %v684_v2, %s645_s23  ;;  %261 = vrot.lane.b32.xlu1 %v187_v10, %s645_s23 }
  0x5e   :  { %263 = vrot.lane.b32.xlu0 %v700_v5, %s645_s23  ;;  %274 = vrot.lane.b32.xlu1 %v684_v2, %s646_s24 }
  0x62   :  { %276 = vrot.lane.b32.xlu0 %v705_v6, %s646_s24  ;;  %278 = vrot.lane.b32.xlu1 %v700_v5, %s646_s24 }
  0x66   :  { %280 = vrot.lane.b32.xlu0 %v205_v11, %s646_s24  ;;  %291 = vrot.lane.b32.xlu1 %v186_v9, %s647_s25 }
  0x6a   :  { %293 = vrot.lane.b32.xlu0 %v684_v2, %s647_s25  ;;  %295 = vrot.lane.b32.xlu1 %v187_v10, %s647_s25 }
  0x6e   :  { %297 = vrot.lane.b32.xlu0 %v700_v5, %s647_s25  ;;  %92 = vrot.lane.b32.xlu1 %v49_v12, %s644_s0 }
  0x72   :  { %110 = vrot.lane.b32.xlu0 %v674_v0, %s645_s23  ;;  %128 = vrot.lane.b32.xlu1 %v49_v12, %s646_s24 }
  0x74   :  { %v812_v13 = vpop.permute.xlu1 %54  ;;  %v34_v14 = vpop.permute.xlu0 %33 }
  0x76   :  { %146 = vrot.lane.b32.xlu0 %v674_v0, %s647_s25  ;;  %308 = vrot.lane.b32.xlu1 %v684_v2, %s649_s26 }
  0x78   :  { %v818_v15 = vpop.permute.xlu0 %35  ;;  %v53_v16 = vpop.permute.xlu1 %52 }
  0x79   :  { %v41_v17 = vsel %vm39_vm0, %v34_v14, %v818_v15  ;;  %v60_v18 = vsel %vm58_vm1, %v53_v16, %v812_v13 }
  0x7a   :  { %47 = vst [vmem:[#allocation2 + $0x8] sm:$0xf0] %v41_v17  ;;  %66 = vst [vmem:[#allocation2 + $0x38] sm:$0xf] %v60_v18  ;;  %310 = vrot.lane.b32.xlu0 %v705_v6, %s649_s26  ;;  %312 = vrot.lane.b32.xlu1 %v700_v5, %s649_s26 }
  0x7c   :  { %v71_v19 = vpop.permute.xlu0 %70  ;;  %v828_v20 = vpop.permute.xlu1 %72 }
  0x7d   :  { %v78_v21 = vsel %vm76_vm2, %v71_v19, %v828_v20 }
  0x7e   :  { %84 = vst [vmem:[#allocation2 + $0x38] sm:$0xf0] %v78_v21  ;;  %314 = vrot.lane.b32.xlu0 %v205_v11, %s649_s26  ;;  %164 = vrot.lane.b32.xlu1 %v49_v12, %s649_s26 }
  0x80   :  { %v32_v24 = vpop.permute.xlu0 %31  ;;  %v51_v25 = vpop.permute.xlu1 %50 }
  0x81   :  { %v40_v26 = vsel %vm39_vm0, %v32_v24, %v34_v14  ;;  %v59_v27 = vsel %vm58_vm1, %v51_v25, %v53_v16  ;;  %v327_v31 = vld [vmem:[#allocation2 + $0x8] sm:$0xff] }
  0x82   :  { %46 = vst [vmem:[#allocation2] sm:$0xf0] %v40_v26  ;;  %65 = vst [vmem:[#allocation2 + $0x30] sm:$0xf] %v59_v27  ;;  %359 = vperm.xlu0 %632, %v356_v23  }
  0x84   :  { %v69_v28 = vpop.permute.xlu0 %68  ;;  %v89_v29 = vpop.permute.xlu1 %88 }
  0x85   :  { %v77_v30 = vsel %vm76_vm2, %v69_v28, %v71_v19  ;;  %v333_v32 = vld [vmem:[#allocation2 + $0x38] sm:$0xff] }
  0x86   :  { %83 = vst [vmem:[#allocation2 + $0x30] sm:$0xf0] %v77_v30  ;;  %v598_v33 = vpack.c.bf16 %v333_v32, %v327_v31 }
  0x88   :  { %v840_v34 = vpop.permute.xlu0 %90  ;;  %v107_v35 = vpop.permute.xlu1 %106  ;;  %599 = vmatprep.subr.bf16.mxu0 %v598_v33 }
  0x89   :  { %v96_v36 = vsel %vm94_vm3, %v89_v29, %v840_v34  ;;  %v326_v40 = vld [vmem:[#allocation2] sm:$0xff] }
  0x8a   :  { %102 = vst [vmem:[#allocation2 + $0x68] sm:$0xf] %v96_v36 }
  0x8c   :  { %v844_v37 = vpop.permute.xlu0 %108  ;;  %v125_v38 = vpop.permute.xlu1 %124 }
  0x8d   :  { %v114_v39 = vsel %vm112_vm4, %v107_v35, %v844_v37  ;;  %v332_v41 = vld [vmem:[#allocation2 + $0x30] sm:$0xff] }
  0x8e   :  { %120 = vst [vmem:[#allocation2 + $0x68] sm:$0xf0] %v114_v39  ;;  %v600_v42 = vpack.c.bf16 %v332_v41, %v326_v40 }
  0x90   :  { %v848_v43 = vpop.permute.xlu0 %126  ;;  %v143_v44 = vpop.permute.xlu1 %142  ;;  %601 = vmatpush1.bf16.msra.mxu0 %v600_v42 }
  0x91   :  { %v132_v45 = vsel %vm130_vm5, %v125_v38, %v848_v43 }
  0x92   :  { %138 = vst [vmem:[#allocation2 + $0x98] sm:$0xf] %v132_v45 }
  0x94   :  { %v852_v46 = vpop.permute.xlu0 %144  ;;  %v87_v47 = vpop.permute.xlu1 %86 }
  0x95   :  { %v150_v48 = vsel %vm148_vm6, %v143_v44, %v852_v46  ;;  %v95_v49 = vsel %vm94_vm3, %v87_v47, %v89_v29  ;;  %v339_v57 = vld [vmem:[#allocation2 + $0x68] sm:$0xff] }
  0x96   :  { %156 = vst [vmem:[#allocation2 + $0x98] sm:$0xf0] %v150_v48  ;;  %101 = vst [vmem:[#allocation2 + $0x60] sm:$0xf] %v95_v49 }
  0x98   :  { %v105_v50 = vpop.permute.xlu0 %104  ;;  %v123_v51 = vpop.permute.xlu1 %122 }
  0x99   :  { %v113_v52 = vsel %vm112_vm4, %v105_v50, %v107_v35  ;;  %v131_v53 = vsel %vm130_vm5, %v123_v51, %v125_v38 }
  0x9a   :  { %119 = vst [vmem:[#allocation2 + $0x60] sm:$0xf0] %v113_v52  ;;  %137 = vst [vmem:[#allocation2 + $0x90] sm:$0xf] %v131_v53  ;;  %v889_v52 = vld [vmem:[%s941_s1] sm:$0xff] }
  0x9c   :  { %v141_v54 = vpop.permute.xlu0 %140  ;;  %v859_v55 = vpop.permute.xlu1 %160 }
  0x9d   :  { %v149_v56 = vsel %vm148_vm6, %v141_v54, %v143_v44  ;;  %v345_v58 = vld [vmem:[#allocation2 + $0x98] sm:$0xff] }
  0x9e   :  { %155 = vst [vmem:[#allocation2 + $0x90] sm:$0xf0] %v149_v56  ;;  %v602_v59 = vpack.c.bf16 %v345_v58, %v339_v57 }
  0xa0   :  { %v862_v60 = vpop.permute.xlu0 %162  ;;  %v189_v61 = vpop.permute.xlu1 %188  ;;  %603 = vmatprep.subr.bf16.mxu0 %v602_v59 }
  0xa1   :  { %v168_v62 = vsel %vm166_vm7, %v859_v55, %v862_v60  ;;  %v338_v3 = vld [vmem:[#allocation2 + $0x60] sm:$0xff] }
  0xa2   :  { %174 = vst [vmem:[#allocation2 + $0xc8] sm:$0xf] %v168_v62 }
  0xa4   :  { %v191_v63 = vpop.permute.xlu0 %190  ;;  %v193_v0 = vpop.permute.xlu1 %192 }
  0xa5   :  { %v196_v1 = vsel %vm39_vm0, %v189_v61, %v191_v63  ;;  %v197_v2 = vsel %vm39_vm0, %v191_v63, %v193_v0  ;;  %v344_v4 = vld [vmem:[#allocation2 + $0x90] sm:$0xff] }
  0xa6   :  { %202 = vst [vmem:[#allocation2 + $0x18] sm:$0xf0] %v196_v1  ;;  %203 = vst [vmem:[#allocation2 + $0x20] sm:$0xf0] %v197_v2  ;;  %v604_v5 = vpack.c.bf16 %v344_v4, %v338_v3 }
  0xa8   :  { %v195_v6 = vpop.permute.xlu0 %194  ;;  %v207_v7 = vpop.permute.xlu1 %206  ;;  %605 = vmatpush1.bf16.msra.mxu0 %v604_v5 }
  0xa9   :  { %v198_v9 = vsel %vm39_vm0, %v193_v0, %v195_v6  ;;  %v351_v10 = vld [vmem:[#allocation2 + $0xc8] sm:$0xff] }
  0xaa   :  { %204 = vst [vmem:[#allocation2 + $0x28] sm:$0xf0] %v198_v9  ;;  %374 = vmatprep.subr.mxu0 %v351_v10 }
  0xac   :  { %v209_v11 = vpop.permute.xlu0 %208  ;;  %v211_v12 = vpop.permute.xlu1 %210 }
  0xad   :  { %v214_v14 = vsel %vm58_vm1, %v207_v7, %v209_v11  ;;  %v215_v16 = vsel %vm58_vm1, %v209_v11, %v211_v12  ;;  %v329_v33 = vld [vmem:[#allocation2 + $0x18] sm:$0xff]  ;;  %v330_v56 = vld [vmem:[#allocation2 + $0x20] sm:$0xff] }
  0xae   :  { %220 = vst [vmem:[#allocation2 + $0x48] sm:$0xf] %v214_v14  ;;  %221 = vst [vmem:[#allocation2 + $0x50] sm:$0xf] %v215_v16 }
  0xb0   :  { %v213_v17 = vpop.permute.xlu0 %212  ;;  %v224_v18 = vpop.permute.xlu1 %223 }
  0xb1   :  { %v216_v19 = vsel %vm58_vm1, %v211_v12, %v213_v17  ;;  %v331_v51 = vld [vmem:[#allocation2 + $0x28] sm:$0xff] }
  0xb2   :  { %222 = vst [vmem:[#allocation2 + $0x58] sm:$0xf] %v216_v19 }
  0xb4   :  { %v226_v21 = vpop.permute.xlu0 %225  ;;  %v228_v22 = vpop.permute.xlu1 %227 }
  0xb5   :  { %v231_v23 = vsel %vm76_vm2, %v224_v18, %v226_v21  ;;  %v232_v24 = vsel %vm76_vm2, %v226_v21, %v228_v22 }
  0xb6   :  { %237 = vst [vmem:[#allocation2 + $0x48] sm:$0xf0] %v231_v23  ;;  %238 = vst [vmem:[#allocation2 + $0x50] sm:$0xf0] %v232_v24 }
  0xb8   :  { %v230_v25 = vpop.permute.xlu0 %229  ;;  %v38_v26 = vpop.permute.xlu1 %37 }
  0xb9   :  { %v233_v27 = vsel %vm76_vm2, %v228_v22, %v230_v25  ;;  %v42_v28 = vsel %vm39_vm0, %v818_v15, %v38_v26 }
  0xba   :  { %239 = vst [vmem:[#allocation2 + $0x58] sm:$0xf0] %v233_v27  ;;  %48 = vst [vmem:[#allocation2 + $0x10] sm:$0xf0] %v42_v28 }
  0xbc   :  { %v57_v29 = vpop.permute.xlu0 %56  ;;  %v75_v30 = vpop.permute.xlu1 %74 }
  0xbd   :  { %v61_v31 = vsel %vm58_vm1, %v812_v13, %v57_v29  ;;  %v79_v32 = vsel %vm76_vm2, %v828_v20, %v75_v30  ;;  %v335_v35 = vld [vmem:[#allocation2 + $0x48] sm:$0xff]  ;;  %v336_v48 = vld [vmem:[#allocation2 + $0x50] sm:$0xff] }
  0xbe   :  { %67 = vst [vmem:[#allocation2 + $0x40] sm:$0xf] %v61_v31  ;;  %85 = vst [vmem:[#allocation2 + $0x40] sm:$0xf0] %v79_v32  ;;  %v606_v36 = vpack.c.bf16 %v335_v35, %v329_v33  ;;  %v616_v57 = vpack.c.bf16 %v336_v48, %v330_v56 }
  0xc0   :  { %v159_v38 = vpop.permute.xlu0 %158  ;;  %607 = vmatprep.subr.bf16.mxu1 %v606_v36  ;;  %v241_v39 = vpop.permute.xlu1 %240 }
  0xc1   :  { %v167_v15 = vsel %vm166_vm7, %v159_v38, %v859_v55  ;;  %v328_v44 = vld [vmem:[#allocation2 + $0x10] sm:$0xff]  ;;  %v337_v47 = vld [vmem:[#allocation2 + $0x58] sm:$0xff] }
  0xc2   :  { %173 = vst [vmem:[#allocation2 + $0xc0] sm:$0xf] %v167_v15  ;;  %v614_v55 = vpack.c.bf16 %v337_v47, %v331_v51 }
  0xc4   :  { %v243_v40 = vpop.permute.xlu0 %242  ;;  %v245_v41 = vpop.permute.xlu1 %244 }
  0xc5   :  { %v248_v42 = vsel %vm94_vm3, %v241_v39, %v243_v40  ;;  %v249_v13 = vsel %vm94_vm3, %v243_v40, %v245_v41  ;;  %v334_v20 = vld [vmem:[#allocation2 + $0x40] sm:$0xff] }
  0xc6   :  { %254 = vst [vmem:[#allocation2 + $0x78] sm:$0xf] %v248_v42  ;;  %255 = vst [vmem:[#allocation2 + $0x80] sm:$0xf] %v249_v13  ;;  %v608_v45 = vpack.c.bf16 %v334_v20, %v328_v44 }
  0xc8   :  { %v247_v49 = vpop.permute.xlu0 %246  ;;  %609 = vmatpush1.bf16.msra.mxu1 %v608_v45  ;;  %v258_v50 = vpop.permute.xlu1 %257 }
  0xc9   :  { %v250_v53 = vsel %vm94_vm3, %v245_v41, %v247_v49  ;;  %v350_v54 = vld [vmem:[#allocation2 + $0xc0] sm:$0xff] }
  0xca   :  { %256 = vst [vmem:[#allocation2 + $0x88] sm:$0xf] %v250_v53  ;;  %375 = vmatpush1.msra.mxu0 %v350_v54 }
  0xcb   :  { %615 = vmatprep.subr.bf16.mxu0 %v614_v55  ;;  %592 = vmatmul.mubr.msk.f32.vlgmr.msra.gmra.mrb[0].mxu0 %vm362_vm8, %v889_v52 }
  0xcc   :  { %v260_v58 = vpop.permute.xlu0 %259  ;;  %v262_v59 = vpop.permute.xlu1 %261  ;;  %617 = vmatpush1.bf16.msra.mxu0 %v616_v57  ;;  %572 = vmatprep.mubr.f32.mxu0 %v648_v8 }
  0xcd   :  { %v265_v61 = vsel %vm112_vm4, %v258_v50, %v260_v58  ;;  %v266_v62 = vsel %vm112_vm4, %v260_v58, %v262_v59 }
  0xce   :  { %271 = vst [vmem:[#allocation2 + $0x78] sm:$0xf0] %v265_v61  ;;  %272 = vst [vmem:[#allocation2 + $0x80] sm:$0xf0] %v266_v62 }
  0xd0   :  { %v264_v63 = vpop.permute.xlu0 %263  ;;  %v275_v0 = vpop.permute.xlu1 %274 }
  0xd1   :  { %v267_v1 = vsel %vm112_vm4, %v262_v59, %v264_v63 }
  0xd2   :  { %273 = vst [vmem:[#allocation2 + $0x88] sm:$0xf0] %v267_v1 }
  0xd4   :  { %v277_v2 = vpop.permute.xlu0 %276  ;;  %v279_v3 = vpop.permute.xlu1 %278 }
  0xd5   :  { %v282_v4 = vsel %vm130_vm5, %v275_v0, %v277_v2  ;;  %v283_v5 = vsel %vm130_vm5, %v277_v2, %v279_v3  ;;  %v341_v24 = vld [vmem:[#allocation2 + $0x78] sm:$0xff] }
  0xd6   :  { %288 = vst [vmem:[#allocation2 + $0xa8] sm:$0xf] %v282_v4  ;;  %289 = vst [vmem:[#allocation2 + $0xb0] sm:$0xf] %v283_v5 }
  0xd8   :  { %v281_v8 = vpop.permute.xlu0 %280  ;;  %v292_v6 = vpop.permute.xlu1 %291 }
  0xd9   :  { %v284_v7 = vsel %vm130_vm5, %v279_v3, %v281_v8  ;;  %v343_v30 = vld [vmem:[#allocation2 + $0x88] sm:$0xff] }
  0xda   :  { %290 = vst [vmem:[#allocation2 + $0xb8] sm:$0xf] %v284_v7 }
  0xdc   :  { %v294_v9 = vpop.permute.xlu0 %293  ;;  %v296_v10 = vpop.permute.xlu1 %295 }
  0xdd   :  { %v299_v11 = vsel %vm148_vm6, %v292_v6, %v294_v9  ;;  %v300_v12 = vsel %vm148_vm6, %v294_v9, %v296_v10 }
  0xde   :  { %305 = vst [vmem:[#allocation2 + $0xa8] sm:$0xf0] %v299_v11  ;;  %306 = vst [vmem:[#allocation2 + $0xb0] sm:$0xf0] %v300_v12 }
  0xe0   :  { %v298_v14 = vpop.permute.xlu0 %297  ;;  %v93_v16 = vpop.permute.xlu1 %92 }
  0xe1   :  { %v301_v17 = vsel %vm148_vm6, %v296_v10, %v298_v14  ;;  %v97_v18 = vsel %vm94_vm3, %v840_v34, %v93_v16 }
  0xe2   :  { %307 = vst [vmem:[#allocation2 + $0xb8] sm:$0xf0] %v301_v17  ;;  %103 = vst [vmem:[#allocation2 + $0x70] sm:$0xf] %v97_v18 }
  0xe4   :  { %v111_v19 = vpop.permute.xlu0 %110  ;;  %v129_v21 = vpop.permute.xlu1 %128 }
  0xe5   :  { %v115_v22 = vsel %vm112_vm4, %v844_v37, %v111_v19  ;;  %v133_v23 = vsel %vm130_vm5, %v848_v43, %v129_v21  ;;  %v347_v25 = vld [vmem:[#allocation2 + $0xa8] sm:$0xff]  ;;  %v348_v29 = vld [vmem:[#allocation2 + $0xb0] sm:$0xff]  ;;  %v342_v37 = vld [vmem:[#allocation2 + $0x80] sm:$0xff] }
  0xe6   :  { %121 = vst [vmem:[#allocation2 + $0x70] sm:$0xf0] %v115_v22  ;;  %139 = vst [vmem:[#allocation2 + $0xa0] sm:$0xf] %v133_v23  ;;  %v610_v26 = vpack.c.bf16 %v347_v25, %v341_v24  ;;  %v620_v33 = vpack.c.bf16 %v348_v29, %v342_v37 }
  0xe8   :  { %v147_v27 = vpop.permute.xlu0 %146  ;;  %611 = vmatprep.subr.bf16.mxu1 %v610_v26  ;;  %v309_v28 = vpop.permute.xlu1 %308 }
  0xe9   :  { %v151_v34 = vsel %vm148_vm6, %v852_v46, %v147_v27  ;;  %v349_v31 = vld [vmem:[#allocation2 + $0xb8] sm:$0xff] }
  0xea   :  { %157 = vst [vmem:[#allocation2 + $0xa0] sm:$0xf0] %v151_v34  ;;  %v618_v32 = vpack.c.bf16 %v349_v31, %v343_v30 }
  0xec   :  { %v311_v35 = vpop.permute.xlu0 %310  ;;  %v313_v43 = vpop.permute.xlu1 %312  ;;  %619 = vmatprep.subr.bf16.mxu0 %v618_v32 }
  0xed   :  { %v316_v36 = vsel %vm166_vm7, %v309_v28, %v311_v35  ;;  %v317_v38 = vsel %vm166_vm7, %v311_v35, %v313_v43  ;;  %621 = vmatpush1.bf16.msra.mxu0 %v620_v33  ;;  %v340_v41 = vld [vmem:[#allocation2 + $0x70] sm:$0xff] }
  0xee   :  { %322 = vst [vmem:[#allocation2 + $0xd8] sm:$0xf] %v316_v36  ;;  %323 = vst [vmem:[#allocation2 + $0xe0] sm:$0xf] %v317_v38 }
  0xf0   :  { %v315_v39 = vpop.permute.xlu0 %314  ;;  %v165_v15 = vpop.permute.xlu1 %164 }
  0xf1   :  { %v318_v46 = vsel %vm166_vm7, %v313_v43, %v315_v39  ;;  %v169_v40 = vsel %vm166_vm7, %v862_v60, %v165_v15  ;;  %v346_v42 = vld [vmem:[#allocation2 + $0xa0] sm:$0xff] }
  0xf2   :  { %324 = vst [vmem:[#allocation2 + $0xe8] sm:$0xf] %v318_v46  ;;  %175 = vst [vmem:[#allocation2 + $0xd0] sm:$0xf] %v169_v40  ;;  %v612_v13 = vpack.c.bf16 %v346_v42, %v340_v41 }
  0xf4   :  { %613 = vmatpush1.bf16.msra.mxu1 %v612_v13 }
  0xf5   :  { %v353_v44 = vld [vmem:[#allocation2 + $0xd8] sm:$0xff]  ;;  %v354_v47 = vld [vmem:[#allocation2 + $0xe0] sm:$0xff] }
  0xf6   :  { %445 = vmatprep.subr.mxu1 %v353_v44 }
  0xf9   :  { %v352_v20 = vld [vmem:[#allocation2 + $0xd0] sm:$0xff]  ;;  %v355_v45 = vld [vmem:[#allocation2 + $0xe8] sm:$0xff] }
  0xfa   :  { %446 = vmatpush1.msra.mxu1 %v352_v20  ;;  %516 = vmatprep.subr.mxu0 %v355_v45 }
  0xfb   :  { %593 = vmatmul.mubr.msk.f32.vlgmr.msra.gmra.mrb[0].mxu1 %vm362_vm8, %v889_v52  ;;  %517 = vmatpush1.msra.mxu0 %v354_v47 }
  0xfc   :  { %594 = vmatmul.mubr.msk.f32.vlgmr.msra.gmra.mrb[2].mxu0 %vm362_vm8, %v889_v52 }
 0x101   :  { %v360_v60 = vpop.permute.xlu0 %359 }
 0x19e   :  { %v432_v48 = vpop.f32.mrb[0].mxu0 }
 0x19f   :  { %v433_v49 = vadd.f32 %v432_v48, %v360_v60  ;;  %v434_v50 = vpop.f32.mrb[1].mxu0 }
 0x1a0   :  { %v435_v51 = vadd.f32 %v434_v50, %v360_v60 }
 0x1a1   :  { %579 = vst [vmem:[%s942_s3] sm:$0xff] %v433_v49 }
 0x1a2   :  { %580 = vst [vmem:[%s942_s3 + $0x8] sm:$0xff] %v435_v51 }
 0x1ce   :  { %v503_v53 = vpop.f32.mrb[0].mxu1 }
 0x1cf   :  { %v504_v54 = vadd.f32 %v503_v53, %v360_v60  ;;  %v505_v55 = vpop.f32.mrb[1].mxu1  ;;  %v574_v56 = vpop.f32.mrb[2].mxu0 }
 0x1d0   :  { %v506_v57 = vadd.f32 %v505_v55, %v360_v60  ;;  %v575_v58 = vadd.f32 %v574_v56, %v360_v60  ;;  %v576_v52 = vpop.f32.mrb[3].mxu0 }
 0x1d1   :  { %581 = vst [vmem:[%s942_s3 + $0x10] sm:$0xff] %v504_v54  ;;  %v577_v59 = vadd.f32 %v576_v52, %v360_v60 }
 0x1d2   :  { %595 = vst [vmem:[%s942_s3 + $0x18] sm:$0xff] %v506_v57  ;;  %596 = vst [vmem:[%s942_s3 + $0x20] sm:$0xff] %v575_v58 }
 0x1d3   :  { %597 = vst [vmem:[%s942_s3 + $0x28] sm:$0xff] %v577_v59 }

</bundles_post_ra>
